<compile_context>
chip_gen: v5e
topology: v5e:2x2
jax: 0.10.0
libtpu: 0.0.40
codegen_flags: <defaults>
</compile_context>

<pallas_src>
import jax
import jax.numpy as jnp
from jax.experimental import pallas as pl
from jax.experimental.pallas import tpu as pltpu

SAFE_SOFTPLUS_EPS = 1e-6  # safe_softplus(x) = softplus(x) + eps (gpssm convention)
# TODO(synk): if gpssm's safe_softplus uses a clamp/threshold variant instead of
# softplus(x)+eps, adjust the constant/formula above.


# --------------------------------------------------------------------------
# Fused kernel: loc copy (per batch tile) + one-time diagonal cov build.
# --------------------------------------------------------------------------
def _emissions_kernel(var_ref, state_ref, loc_ref, cov_ref):
    # var_ref:   (Dy, 1)        float32 raw (pre-softplus) variance parameter
    # state_ref: (TB, Dy, P)    pre-sliced state block (fused slice of state)
    # loc_ref:   (TB, Dy, P)
    # cov_ref:   (Dy, P, P)     resident block, written once at grid step 0

    # loc: straight copy of the block (store-bound; lane-dense whenever P>=128).
    loc_ref[...] = state_ref[...]

    @pl.when(pl.program_id(0) == 0)
    def _():
        dy, p, _ = cov_ref.shape
        # softplus + eps in float32; cast only at the final store.
        x = var_ref[...].astype(jnp.float32)                  # (Dy, 1)
        var = jax.nn.softplus(x) + SAFE_SOFTPLUS_EPS          # (Dy, 1) f32
        row = jax.lax.broadcasted_iota(jnp.int32, (dy, p, p), 1)
        col = jax.lax.broadcasted_iota(jnp.int32, (dy, p, p), 2)
        diag = row == col
        cov_ref[...] = jnp.where(diag, var[:, :, None], 0.0).astype(cov_ref.dtype)


# --------------------------------------------------------------------------
# Tiling heuristic
# --------------------------------------------------------------------------
def _pick_batch_tile(batch, bytes_per_batch_elem, target_bytes=1 << 20):
    """Batch elements per grid step targeting ~1 MiB blocks (copy-roofline
    sweet spot) while dividing the batch exactly."""
    tb = max(1, min(batch, target_bytes // max(bytes_per_batch_elem, 1)))
    while batch % tb:
        tb -= 1
    return tb


# --------------------------------------------------------------------------
# Wrapper
# --------------------------------------------------------------------------
def emissions_forward(state: jax.Array, variance_t: jax.Array, dim_outputs: int):
    """Pallas implementation of Emissions.forward for a Tensor state.

    Args:
      state: (B, D_state, P).
      variance_t: (dim_outputs,) raw variance parameter.
    Returns:
      loc: (B, dim_outputs, P)
      cov: (B, dim_outputs, P, P)   (batch-invariant; lazily broadcast in XLA)
    """
    B, D, P = state.shape
    Dy = dim_outputs
    dtype = state.dtype
    itemsize = jnp.dtype(dtype).itemsize

    # Slice once in the wrapper; allow_input_fusion lets XLA fuse this slice
    # into the pallas_call input DMA instead of materializing it in HBM.
    state_loc = state[:, :Dy, :]

    # Raw parameter stays float32 all the way into the kernel (eps is below
    # bf16 resolution near 1.0, so softplus/eps must not run in low precision).
    var_col = variance_t.reshape(Dy, 1).astype(jnp.float32)

    tb = _pick_batch_tile(B, Dy * P * itemsize)
    n_steps = B // tb

    # Explicit VMEM budget: double-buffered state+loc blocks plus the resident
    # cov block (kept well under v5e's 16 MiB default when shapes are small).
    block_bytes = tb * Dy * P * itemsize
    cov_bytes = Dy * P * P * itemsize
    vmem_limit = int(min(max(4 * block_bytes + 2 * cov_bytes + (2 << 20), 8 << 20),
                         48 << 20))

    loc, cov_single = pl.pallas_call(
        _emissions_kernel,
        out_shape=(
            jax.ShapeDtypeStruct((B, Dy, P), dtype),
            jax.ShapeDtypeStruct((Dy, P, P), dtype),
        ),
        grid=(n_steps,),
        in_specs=[
            pl.BlockSpec((Dy, 1), lambda b: (0, 0)),          # variance_t
            pl.BlockSpec((tb, Dy, P), lambda b: (b, 0, 0)),   # sliced state
        ],
        out_specs=(
            pl.BlockSpec((tb, Dy, P), lambda b: (b, 0, 0)),   # loc
            pl.BlockSpec((Dy, P, P), lambda b: (0, 0, 0)),    # cov (resident)
        ),
        compiler_params=pltpu.CompilerParams(
            dimension_semantics=("arbitrary",),               # cov block resident
            allow_input_fusion=[False, True],                 # fuse the state slice
            vmem_limit_bytes=vmem_limit,
        ),
    )(var_col, state_loc)

    # One lazy broadcast to the (B, Dy, P, P) shape the torch module returns.
    # NOTE: keep cov un-materialized downstream if possible (for large B/P the
    # dense HBM write of the broadcast would dwarf everything done here).
    cov = jnp.broadcast_to(cov_single[None], (B, Dy, P, P))
    return loc, cov


def _inverse_softplus(y: float) -> float:
    # log(exp(y) - 1)
    return float(jnp.log(jnp.expm1(jnp.asarray(y, jnp.float32))))


# --------------------------------------------------------------------------
# Demo / validation
# --------------------------------------------------------------------------
if __name__ == "__main__":
    # Module config (deterministic, no checkpoint load).
    dim_outputs = 3
    init_variance = 1.0

    # Parameter init exactly as in __init__: ones(dim_outputs) * inverse_softplus(variance)
    variance_t = jnp.ones((dim_outputs,), jnp.float32) * _inverse_softplus(init_variance)

    # Example input: state of shape (batch_size, dim_states, num_particles)
    batch_size, dim_states, num_particles = 2, 4, 16
    key = jax.random.PRNGKey(0)
    state = jax.random.normal(key, (batch_size, dim_states, num_particles), jnp.float32)

    loc, cov = emissions_forward(state, variance_t, dim_outputs)
    loc, cov = jax.block_until_ready((loc, cov))

    # Pure-JAX reference for validation.
    var_ref = jax.nn.softplus(variance_t) + SAFE_SOFTPLUS_EPS
    loc_ref = state[:, :dim_outputs, :]
    cov_ref = (var_ref[None, :, None, None]
               * jnp.eye(num_particles, dtype=jnp.float32)[None, None, :, :])
    cov_ref = jnp.broadcast_to(
        cov_ref, (batch_size, dim_outputs, num_particles, num_particles))

    assert loc.shape == (batch_size, dim_outputs, num_particles)
    assert cov.shape == (batch_size, dim_outputs, num_particles, num_particles)
    assert jnp.allclose(loc, loc_ref, atol=1e-6)
    assert jnp.allclose(cov, cov_ref, atol=1e-6)

    # TODO(synk): PyTorch returns a MultivariateNormal(loc, cov) distribution
    # object; here we return the (loc, cov) tensors that parameterize it.
    print("KERNEL_OK")
</pallas_src>

<mosaic_0001>
module attributes {stable_mosaic.version = 11 : i64} {
  func.func @_emissions_kernel(%arg0: i32, %arg1: memref<3x1xf32, #tpu.memory_space<vmem>>, %arg2: memref<2x3x16xf32, #tpu.memory_space<vmem>>, %arg3: memref<2x3x16xf32, #tpu.memory_space<vmem>>, %arg4: memref<3x16x16xf32, #tpu.memory_space<vmem>>) attributes {dimension_semantics = [#tpu.dimension_semantics<arbitrary>], iteration_bounds = array<i64: 1>, scalar_prefetch = 0 : i64, scratch_operands = 0 : i64, tpu.core_type = #tpu.core_type<tc>, window_params = [{pipeline_mode = #tpu.pipeline_mode<synchronous>, transform_indices = @transform_0, window_bounds = array<i64: 3, 1>}, {transform_indices = @transform_1, window_bounds = array<i64: 2, 3, 16>}, {transform_indices = @transform_2, window_bounds = array<i64: 2, 3, 16>}, {pipeline_mode = #tpu.pipeline_mode<synchronous>, transform_indices = @transform_3, window_bounds = array<i64: 3, 16, 16>}]} {
    %c0 = arith.constant 0 : index
    %c0_0 = arith.constant 0 : index
    %c0_1 = arith.constant 0 : index
    %0 = vector.load %arg2[%c0, %c0_0, %c0_1] : memref<2x3x16xf32, #tpu.memory_space<vmem>>, vector<2x3x16xf32>
    %c0_2 = arith.constant 0 : index
    %c0_3 = arith.constant 0 : index
    %c0_4 = arith.constant 0 : index
    %1 = vector.load %arg3[%c0_2, %c0_3, %c0_4] : memref<2x3x16xf32, #tpu.memory_space<vmem>>, vector<2x3x16xf32>
    tpu.vector_store %arg3[%c0_2, %c0_3, %c0_4], %0 {strides = array<i32>} : memref<2x3x16xf32, #tpu.memory_space<vmem>>, vector<2x3x16xf32>,
    %c0_i32 = arith.constant 0 : i32
    %2 = arith.cmpi eq, %arg0, %c0_i32 : i32
    %3 = arith.extui %2 : i1 to i32
    %c0_i32_5 = arith.constant 0 : i32
    %4 = arith.cmpi ne, %3, %c0_i32_5 : i32
    scf.if %4 {
      %c0_6 = arith.constant 0 : index
      %c0_7 = arith.constant 0 : index
      %5 = vector.load %arg1[%c0_6, %c0_7] : memref<3x1xf32, #tpu.memory_space<vmem>>, vector<3x1xf32>
      %cst = arith.constant 0.000000e+00 : f32
      %6 = vector.broadcast %cst : f32 to vector<3x1xf32>
      %7 = arith.maximumf %5, %6 : vector<3x1xf32>
      %8 = vector.broadcast %cst : f32 to vector<3x1xf32>
      %9 = arith.subf %5, %8 : vector<3x1xf32>
      %10 = arith.cmpf one, %9, %9 : vector<3x1xf32>
      %11 = vector.broadcast %cst : f32 to vector<3x1xf32>
      %12 = arith.addf %5, %11 : vector<3x1xf32>
      %13 = math.absf %9 : vector<3x1xf32>
      %cst_8 = arith.constant 0.000000e+00 : f32
      %14 = vector.broadcast %cst_8 : f32 to vector<3x1xf32>
      %15 = arith.subf %14, %13 : vector<3x1xf32>
      %16 = math.exp %15 : vector<3x1xf32>
      %17 = math.log1p %16 : vector<3x1xf32>
      %18 = arith.addf %7, %17 : vector<3x1xf32>
      %19 = arith.select %10, %12, %18 : vector<3x1xi1>, vector<3x1xf32>
      %cst_9 = arith.constant 9.99999997E-7 : f32
      %20 = vector.broadcast %cst_9 : f32 to vector<3x1xf32>
      %21 = arith.addf %19, %20 : vector<3x1xf32>
      %22 = tpu.iota {dimensions = array<i32: 1>} : vector<3x16x16xi32>
      %23 = tpu.iota {dimensions = array<i32: 2>} : vector<3x16x16xi32>
      %24 = arith.cmpi eq, %22, %23 : vector<3x16x16xi32>
      %25 = vector.shape_cast %21 : vector<3x1xf32> to vector<3x1x1xf32>
      %cst_10 = arith.constant 0.000000e+00 : f32
      %26 = vector.shape_cast %25 : vector<3x1x1xf32> to vector<3x1x1xf32>
      %27 = vector.broadcast %26 : vector<3x1x1xf32> to vector<3x16x16xf32>
      %28 = vector.broadcast %cst_10 : f32 to vector<3x16x16xf32>
      %29 = arith.select %24, %27, %28 : vector<3x16x16xi1>, vector<3x16x16xf32>
      %c0_11 = arith.constant 0 : index
      %c0_12 = arith.constant 0 : index
      %c0_13 = arith.constant 0 : index
      %30 = vector.load %arg4[%c0_11, %c0_12, %c0_13] : memref<3x16x16xf32, #tpu.memory_space<vmem>>, vector<3x16x16xf32>
      tpu.vector_store %arg4[%c0_11, %c0_12, %c0_13], %29 {strides = array<i32>} : memref<3x16x16xf32, #tpu.memory_space<vmem>>, vector<3x16x16xf32>,
    } else {
    }
    return
  }
  func.func @transform_0(%arg0: i32) -> (i32, i32) {
    %c0_i32 = arith.constant 0 : i32
    %c0_i32_0 = arith.constant 0 : i32
    %c0_i32_1 = arith.constant 0 : i32
    return %c0_i32, %c0_i32_0 : i32, i32
  }
  func.func @transform_1(%arg0: i32) -> (i32, i32, i32) {
    %c0_i32 = arith.constant 0 : i32
    %c0_i32_0 = arith.constant 0 : i32
    %c0_i32_1 = arith.constant 0 : i32
    return %arg0, %c0_i32, %c0_i32_0 : i32, i32, i32
  }
  func.func @transform_2(%arg0: i32) -> (i32, i32, i32) {
    %c0_i32 = arith.constant 0 : i32
    %c0_i32_0 = arith.constant 0 : i32
    %c0_i32_1 = arith.constant 0 : i32
    return %arg0, %c0_i32, %c0_i32_0 : i32, i32, i32
  }
  func.func @transform_3(%arg0: i32) -> (i32, i32, i32) {
    %c0_i32 = arith.constant 0 : i32
    %c0_i32_0 = arith.constant 0 : i32
    %c0_i32_1 = arith.constant 0 : i32
    %c0_i32_2 = arith.constant 0 : i32
    return %c0_i32, %c0_i32_0, %c0_i32_1 : i32, i32, i32
  }
}

</mosaic_0001>

<bundles_post_ra>
// kernel: tpu_custom_call.1
= control target key start
LH: loop header
LB: loop body
LE: loop exit
PB: predicated region body
PF: predicated region fallthrough
CT: control target
= control target key end

     0   :  { %s193_s0 = inlined_call_operand.vmem [shape: f32[3,1], index: 0, kind: input, shape index: {}]   ;;  %s194_s1 = inlined_call_operand.vmem [shape: f32[2,3,16], index: 1, kind: input, shape index: {}]   ;;  %s195_s2 = inlined_call_operand.vmem [shape: f32[2,3,16], index: 2, kind: output, shape index: {0}]   ;;  %s196_s3 = inlined_call_operand.hbm [shape: f32[3,16,16], index: 3, kind: output, shape index: {1}]  }
   0x1   :  { %v23_v0 = vld [vmem:[%s193_s0] sm:$0x7] }
   0x2   :  { %9 = vsyncpa [#allocation3], 0  ;;  %v139_v1 = vmov 0   ;;  %v27_v2 = vand.u32 2147483647, %v23_v0  ;;  %v24_v12 = vmax.f32 %v23_v0, 0.0  ;;  %vm25_vm1 = vcmp.ne.f32.partialorder %v23_v0, %v23_v0 }
   0x3   :  { %107 = vset.pattern.permute.xlu0 %v139_v1  ;;  %108 = vset.pattern.permute.xlu1 %v139_v1  ;;  %v14_v23 = vld [vmem:[%s194_s1] sm:$0x7]  ;;  %v15_v24 = vld [vmem:[%s194_s1 + $0x4] sm:$0x7]  ;;  %vm16_vm2 = vcmask 124928   ;;  %v43_v25 = vlaneseq  ;;  %vm74_vm5 = vcmask 130048  }
   0x4   :  { %v28_v3 = vsub.f32 0.0, %v27_v2  ;;  %17 = vst.msk [vmem:[%s195_s2] sm:$0x7] %vm16_vm2, %v14_v23  ;;  %s140_s1 = smov [#allocation2]   ;;  %s89_s23 = sshll.u32 %s196_s3, 4  ;;  %s90_s23 = int_to_ptr.hbm [resolvable:$true] %s89_s23 }
   0x5   :  { %18 = vst.msk [vmem:[%s195_s2 + $0x4] sm:$0x7] %vm16_vm2, %v15_v24  ;;  %v44_v26 = vshrl.u32 %v43_v25, 7  ;;  %v47_v28 = vand.u32 127, %v43_v25  ;;  %s87_s2 = sshll.u32 %s140_s1, 4  ;;  %s141_s24 = smov 128   ;;  %s88_s2 = int_to_ptr.vmem [resolvable:$true] %s87_s2 }
   0x6   :  { %v29_v4 = vmul.f32 1.442695, %v28_v3  ;;  %s142_s25 = smov 8  }
   0x7   :  { %v45_v27 = vadd.s32 8, %v44_v26  ;;  %vm48_vm3 = vcmp.eq.s32.totalorder %v44_v26, %v47_v28 }
   0x8   :  { %109 = vpow2.f32 %v29_v4 }
   0x9   :  { %vm49_vm4 = vcmp.eq.s32.totalorder %v45_v27, %v47_v28 }
   0xe   :  { %v110_v5 = vpop.eup %109 }
   0xf   :  { %v31_v6 = vadd.f32 1.0, %v110_v5  ;;  %v34_v7 = vmul.f32 -0.5, %v110_v5  ;;  %v37_v9 = vand.u32 2147483647, %v110_v5 }
  0x11   :  { %111 = vlog2.f32 %v31_v6  ;;  %v35_v8 = vadd.f32 1.0, %v34_v7  ;;  %vm38_vm0 = vcmp.lt.f32.partialorder %v37_v9, 0.0004427343 }
  0x13   :  { %v36_v10 = vmul.f32 %v110_v5, %v35_v8 }
  0x17   :  { %v112_v11 = vpop.eup %111 }
  0x18   :  { %v33_v13 = vmul.f32 0.6931472, %v112_v11 }
  0x1a   :  { %v39_v14 = vsel %vm38_vm0, %v36_v10, %v33_v13 }
  0x1b   :  { %v40_v15 = vadd.f32 %v39_v14, %v24_v12 }
  0x1d   :  { %v41_v16 = vsel %vm25_vm1, %v23_v0, %v40_v15 }
  0x1e   :  { %v42_v17 = vadd.f32 1e-06, %v41_v16 }
  0x20   :  { %v53_v18 = vperm.slane %v42_v17, 0  ;;  %v52_v19 = vrot.slane %v42_v17, 2  ;;  %v51_v21 = vrot.slane %v42_v17, 1 }
  0x22   :  { %57 = vperm.xlu0 %107, %v53_v18   ;;  %v55_v20 = vperm.slane %v52_v19, 0  ;;  %v54_v22 = vperm.slane %v51_v21, 0 }
  0x24   :  { %65 = vperm.xlu1 %108, %v55_v20  }
  0x2a   :  { %61 = vperm.xlu0 %107, %v54_v22  }
  0x94   :  { %v58_v29 = vpop.permute.xlu0 %57 }
  0x95   :  { %v68_v30 = vsel %vm48_vm3, %v58_v29, 0.0  ;;  %v69_v31 = vsel %vm49_vm4, %v58_v29, 0.0 }
  0x96   :  { %75 = vst.msk [vmem:[#allocation2] sm:$0xff] %vm74_vm5, %v68_v30  ;;  %v66_v32 = vpop.permute.xlu1 %65 }
  0x97   :  { %76 = vst.msk [vmem:[#allocation2 + $0x8] sm:$0xff] %vm74_vm5, %v69_v31  ;;  %v72_v33 = vsel %vm48_vm3, %v66_v32, 0.0  ;;  %v73_v34 = vsel %vm49_vm4, %v66_v32, 0.0 }
  0x98   :  { %79 = vst.msk [vmem:[#allocation2 + $0x20] sm:$0xff] %vm74_vm5, %v72_v33 }
  0x99   :  { %80 = vst.msk [vmem:[#allocation2 + $0x28] sm:$0xff] %vm74_vm5, %v73_v34 }
  0x9c   :  { %v62_v35 = vpop.permute.xlu0 %61 }
  0x9d   :  { %v70_v36 = vsel %vm48_vm3, %v62_v35, 0.0  ;;  %v71_v37 = vsel %vm49_vm4, %v62_v35, 0.0 }
  0x9e   :  { %77 = vst.msk [vmem:[#allocation2 + $0x10] sm:$0xff] %vm74_vm5, %v70_v36 }
  0x9f   :  { %78 = vst.msk [vmem:[#allocation2 + $0x18] sm:$0xff] %vm74_vm5, %v71_v37 }
  0xa0   :  { %95 = dma.vmem_to_hbm [thread:$0]  %s88_s2, 768, %s90_s23, [#allocation3], %s141_s24, %s141_s24, %s142_s25  }
  0xa1   :  { %137 = dma.done.wait [#allocation3], 768  }
  0xa2   :  { %138 = vsyncadd [#allocation3], 4294966528 }
  0xa3   :  { %102 = vsyncpa [#allocation3], 1 }

</bundles_post_ra>
